<compile_context>
chip_gen: v7x
topology: tpu7x:2x2x1
jax: 0.10.0
libtpu: 0.0.40
codegen_flags: <defaults>
</compile_context>

<pallas_src>
import functools

import jax
import jax.numpy as jnp
import numpy as np
from jax.experimental import pallas as pl
from jax.experimental.pallas import tpu as pltpu

LANE = 128


def _sequence_loss_kernel(w_ref, pred_ref, gt_ref, valid_ref, out_ref, vsum_ref,
                          *, max_flow):
    # grid = (L_tiles, N_preds): axis 0 = spatial tile (parallel), axis 1 = pred idx.
    n = pl.program_id(1)

    gt = gt_ref[...].astype(jnp.float32)                      # (B, C, TL, 128)

    @pl.when(n == 0)
    def _init():
        mag = jnp.sqrt(jnp.sum(gt * gt, axis=1))              # (B, TL, 128)
        mask = jnp.logical_and(valid_ref[...].astype(jnp.float32) >= 0.5,
                               mag < max_flow)                # (B, TL, 128)
        # sum of the validity mask over batch, per spatial location
        vsum_ref[...] = jnp.sum(mask.astype(jnp.float32), axis=0)   # (TL, 128)
        out_ref[...] = jnp.zeros_like(out_ref)

    pred = pred_ref[...].astype(jnp.float32)                  # (B, C, TL, 128)
    # mean over the broadcast [B,B,2,H,W] tensor factorizes as
    #   sum_l (sum_b1 mask[b1,l]) * (sum_{b2,c} diff[b2,c,l]) / (B*B*2*H*W)
    dsum = jnp.sum(jnp.abs(pred - gt), axis=(0, 1))           # (TL, 128)
    part = jnp.sum(vsum_ref[...] * dsum, axis=0, keepdims=True)   # (1, 128)
    out_ref[0] = out_ref[0] + w_ref[n] * part


def sequence_loss_pallas(flow_preds, flow_gt, valid, *, gamma, max_flow,
                         max_tile_rows=512):
    """flow_preds: [N, B, 2, H, W]; flow_gt: [B, 2, H, W]; valid: [B, 1, H, W]."""
    N, B, C, H, W = flow_preds.shape
    L = H * W

    l_rows = -(-L // LANE)                                    # ceil(L / 128)
    # Size the L-tile so the (double-buffered) input working set stays ~<= 24 MiB.
    itemsize = jnp.dtype(flow_preds.dtype).itemsize
    row_bytes = 2 * (2 * B * C + B) * LANE * itemsize + LANE * 4
    budget = 24 * 1024 * 1024
    max_rows = max(8, (budget // row_bytes) // 8 * 8)
    TL = max(8, min(max_tile_rows, max_rows, ((l_rows + 7) // 8) * 8))
    l_rows_pad = ((l_rows + TL - 1) // TL) * TL
    L_pad = l_rows_pad * LANE
    num_tiles = l_rows_pad // TL

    def _fold(x, lead_shape):
        x = x.reshape(*lead_shape, L)
        if L_pad != L:
            pad = [(0, 0)] * len(lead_shape) + [(0, L_pad - L)]
            x = jnp.pad(x, pad)                               # zero-pad (valid=0 kills it)
        return x.reshape(*lead_shape, l_rows_pad, LANE)

    preds = _fold(flow_preds, (N, B, C))                      # (N, B, C, Lr, 128)
    gt = _fold(flow_gt, (B, C))                               # (B, C, Lr, 128)
    val = _fold(valid.reshape(B, H, W), (B,))                 # (B, Lr, 128)

    # i_weight = gamma ** (n_predictions - i - 1), prefetched into SMEM.
    weights = gamma ** jnp.arange(N - 1, -1, -1, dtype=jnp.float32)
    inv_count = 1.0 / float(B * B * C * H * W)

    kernel = functools.partial(_sequence_loss_kernel, max_flow=float(max_flow))

    out = pl.pallas_call(
        kernel,
        out_shape=jax.ShapeDtypeStruct((num_tiles, 1, LANE), jnp.float32),
        grid_spec=pltpu.PrefetchScalarGridSpec(
            num_scalar_prefetch=1,
            grid=(num_tiles, N),
            in_specs=[
                # flow_preds[n], spatial tile l; leading size-1 dim squeezed away.
                pl.BlockSpec((None, B, C, TL, LANE), lambda l, n, w: (n, 0, 0, l, 0)),
                # flow_gt, spatial tile l (resident across the inner n loop).
                pl.BlockSpec((B, C, TL, LANE), lambda l, n, w: (0, 0, l, 0)),
                # valid mask, spatial tile l (resident across the inner n loop).
                pl.BlockSpec((B, TL, LANE), lambda l, n, w: (0, l, 0)),
            ],
            # Lane-dense per-tile partial sums; accumulated over n, written once per tile.
            out_specs=pl.BlockSpec((1, 1, LANE), lambda l, n, w: (l, 0, 0)),
            scratch_shapes=[pltpu.VMEM((TL, LANE), jnp.float32)],
        ),
        compiler_params=pltpu.CompilerParams(
            dimension_semantics=("parallel", "arbitrary"),
            vmem_limit_bytes=32 * 1024 * 1024),
    )(weights, preds, gt, val)

    return jnp.sum(out) * inv_count


def sequence_loss_ref(flow_preds, flow_gt, valid, *, gamma, max_flow):
    """Pure-JAX mirror of the PyTorch code (same broadcasting)."""
    n = flow_preds.shape[0]
    mag = jnp.sqrt(jnp.sum(flow_gt ** 2, axis=1, keepdims=True))    # [B,1,H,W]
    v = jnp.logical_and(valid >= 0.5, mag < max_flow)               # [B,1,H,W]
    loss = 0.0
    for i in range(n):
        w = gamma ** (n - i - 1)
        i_loss = jnp.abs(flow_preds[i] - flow_gt)                   # [B,2,H,W]
        prod = v[:, None].astype(jnp.float32) * i_loss              # -> [B,B,2,H,W]
        loss = loss + w * jnp.mean(prod)
    return loss


if __name__ == "__main__":
    # Module hyperparameters (args.gamma / args.max_flow / args.use_matching_loss)
    gamma = 0.8
    max_flow = 5.0          # small so the mag < max_flow condition is exercised
    # use_matching_loss = False

    # Small shapes consistent with the forward pass.
    N_PRED, B, C, H, W = 3, 2, 2, 16, 16

    key = jax.random.PRNGKey(0)
    k1, k2, k3 = jax.random.split(key, 3)

    # Deterministic synthetic inputs mimicking the module's dict layout.
    flow_preds = jax.random.normal(k1, (N_PRED, B, C, H, W), jnp.float32) * 3.0
    flows = jax.random.normal(k2, (B, 1, C, H, W), jnp.float32) * 3.0   # inputs['flows']
    valids = jax.random.uniform(k3, (B, 1, 1, H, W), jnp.float32)       # inputs['valids']

    flow_gt = flows[:, 0]      # [B, 2, H, W]
    valid = valids[:, 0]       # [B, 1, H, W]

    loss = sequence_loss_pallas(flow_preds, flow_gt, valid,
                                gamma=gamma, max_flow=max_flow)
    loss = jax.block_until_ready(loss)

    ref = jax.block_until_ready(
        sequence_loss_ref(flow_preds, flow_gt, valid, gamma=gamma, max_flow=max_flow))

    np.testing.assert_allclose(np.asarray(loss), np.asarray(ref), rtol=1e-5, atol=1e-5)
    print("KERNEL_OK")
</pallas_src>

<mosaic_0001>
module attributes {stable_mosaic.version = 11 : i64} {
  func.func @_sequence_loss_kernel(%arg0: i32, %arg1: i32, %arg2: memref<3xf32, #tpu.memory_space<smem>>, %arg3: memref<1x2x2x8x128xf32, #tpu.memory_space<vmem>>, %arg4: memref<2x2x8x128xf32, #tpu.memory_space<vmem>>, %arg5: memref<2x8x128xf32, #tpu.memory_space<vmem>>, %arg6: memref<1x1x128xf32, #tpu.memory_space<vmem>>, %arg7: memref<8x128xf32, #tpu.memory_space<vmem>>) attributes {dimension_semantics = [#tpu.dimension_semantics<parallel>, #tpu.dimension_semantics<arbitrary>], iteration_bounds = array<i64: 1, 3>, scalar_prefetch = 1 : i64, scratch_operands = 1 : i64, tpu.core_type = #tpu.core_type<tc>, window_params = [{transform_indices = @transform_0, window_bounds = array<i64: 1, 2, 2, 8, 128>}, {transform_indices = @transform_1, window_bounds = array<i64: 2, 2, 8, 128>}, {transform_indices = @transform_2, window_bounds = array<i64: 2, 8, 128>}, {transform_indices = @transform_3, window_bounds = array<i64: 1, 1, 128>}]} {
    %c0 = arith.constant 0 : index
    %c0_0 = arith.constant 0 : index
    %c0_1 = arith.constant 0 : index
    %c0_2 = arith.constant 0 : index
    %0 = vector.load %arg4[%c0, %c0_0, %c0_1, %c0_2] : memref<2x2x8x128xf32, #tpu.memory_space<vmem>>, vector<2x2x8x128xf32>
    %c0_i32 = arith.constant 0 : i32
    %1 = arith.cmpi eq, %arg1, %c0_i32 : i32
    %2 = arith.extui %1 : i1 to i32
    %c0_i32_3 = arith.constant 0 : i32
    %3 = arith.cmpi ne, %2, %c0_i32_3 : i32
    scf.if %3 {
      %23 = arith.mulf %0, %0 : vector<2x2x8x128xf32>
      %cst_18 = arith.constant dense<0.000000e+00> : vector<2x8x128xf32>
      %24 = vector.multi_reduction <add>, %23, %cst_18 [1] : vector<2x2x8x128xf32> to vector<2x8x128xf32>
      %25 = math.sqrt %24 : vector<2x8x128xf32>
      %c0_19 = arith.constant 0 : index
      %c0_20 = arith.constant 0 : index
      %c0_21 = arith.constant 0 : index
      %26 = vector.load %arg5[%c0_19, %c0_20, %c0_21] : memref<2x8x128xf32, #tpu.memory_space<vmem>>, vector<2x8x128xf32>
      %cst_22 = arith.constant 5.000000e-01 : f32
      %27 = vector.broadcast %cst_22 : f32 to vector<2x8x128xf32>
      %28 = arith.cmpf oge, %26, %27 : vector<2x8x128xf32>
      %cst_23 = arith.constant 5.000000e+00 : f32
      %29 = vector.broadcast %cst_23 : f32 to vector<2x8x128xf32>
      %30 = arith.cmpf olt, %25, %29 : vector<2x8x128xf32>
      %31 = arith.andi %28, %30 : vector<2x8x128xi1>
      %32 = arith.extui %31 : vector<2x8x128xi1> to vector<2x8x128xi32>
      %33 = arith.sitofp %32 : vector<2x8x128xi32> to vector<2x8x128xf32>
      %cst_24 = arith.constant dense<0.000000e+00> : vector<8x128xf32>
      %34 = vector.multi_reduction <add>, %33, %cst_24 [0] : vector<2x8x128xf32> to vector<8x128xf32>
      %c0_25 = arith.constant 0 : index
      %c0_26 = arith.constant 0 : index
      %35 = vector.load %arg7[%c0_25, %c0_26] : memref<8x128xf32, #tpu.memory_space<vmem>>, vector<8x128xf32>
      tpu.vector_store %arg7[%c0_25, %c0_26], %34 {strides = array<i32>} : memref<8x128xf32, #tpu.memory_space<vmem>>, vector<8x128xf32>,
      %cst_27 = arith.constant 0.000000e+00 : f32
      %36 = vector.broadcast %cst_27 : f32 to vector<1x1x128xf32>
      %c0_28 = arith.constant 0 : index
      %c0_29 = arith.constant 0 : index
      %c0_30 = arith.constant 0 : index
      %37 = vector.load %arg6[%c0_28, %c0_29, %c0_30] : memref<1x1x128xf32, #tpu.memory_space<vmem>>, vector<1x1x128xf32>
      tpu.vector_store %arg6[%c0_28, %c0_29, %c0_30], %36 {strides = array<i32>} : memref<1x1x128xf32, #tpu.memory_space<vmem>>, vector<1x1x128xf32>,
    } else {
    }
    %c0_4 = arith.constant 0 : index
    %c0_5 = arith.constant 0 : index
    %c0_6 = arith.constant 0 : index
    %c0_7 = arith.constant 0 : index
    %c0_8 = arith.constant 0 : index
    %4 = vector.load %arg3[%c0_4, %c0_5, %c0_6, %c0_7, %c0_8] : memref<1x2x2x8x128xf32, #tpu.memory_space<vmem>>, vector<1x2x2x8x128xf32>
    %5 = vector.shape_cast %4 : vector<1x2x2x8x128xf32> to vector<2x2x8x128xf32>
    %6 = arith.subf %5, %0 : vector<2x2x8x128xf32>
    %7 = math.absf %6 : vector<2x2x8x128xf32>
    %cst = arith.constant dense<0.000000e+00> : vector<8x128xf32>
    %8 = vector.multi_reduction <add>, %7, %cst [0, 1] : vector<2x2x8x128xf32> to vector<8x128xf32>
    %c0_9 = arith.constant 0 : index
    %c0_10 = arith.constant 0 : index
    %9 = vector.load %arg7[%c0_9, %c0_10] : memref<8x128xf32, #tpu.memory_space<vmem>>, vector<8x128xf32>
    %10 = arith.mulf %9, %8 : vector<8x128xf32>
    %cst_11 = arith.constant dense<0.000000e+00> : vector<128xf32>
    %11 = vector.multi_reduction <add>, %10, %cst_11 [0] : vector<8x128xf32> to vector<128xf32>
    %12 = vector.shape_cast %11 : vector<128xf32> to vector<1x128xf32>
    %c0_12 = arith.constant 0 : index
    %c0_13 = arith.constant 0 : index
    %c0_14 = arith.constant 0 : index
    %13 = vector.load %arg6[%c0_12, %c0_13, %c0_14] : memref<1x1x128xf32, #tpu.memory_space<vmem>>, vector<1x1x128xf32>
    %14 = vector.shape_cast %13 : vector<1x1x128xf32> to vector<1x128xf32>
    %15 = arith.index_cast %arg1 : i32 to index
    %16 = memref.load %arg2[%15] : memref<3xf32, #tpu.memory_space<smem>>
    %17 = vector.broadcast %16 : f32 to vector<1x128xf32>
    %18 = arith.mulf %17, %12 : vector<1x128xf32>
    %19 = arith.addf %14, %18 : vector<1x128xf32>
    %c0_15 = arith.constant 0 : index
    %c0_16 = arith.constant 0 : index
    %c0_17 = arith.constant 0 : index
    %20 = vector.load %arg6[%c0_15, %c0_16, %c0_17] : memref<1x1x128xf32, #tpu.memory_space<vmem>>, vector<1x1x128xf32>
    %21 = vector.shape_cast %20 : vector<1x1x128xf32> to vector<1x128xf32>
    %22 = vector.shape_cast %19 : vector<1x128xf32> to vector<1x1x128xf32>
    tpu.vector_store %arg6[%c0_15, %c0_16, %c0_17], %22 {strides = array<i32>} : memref<1x1x128xf32, #tpu.memory_space<vmem>>, vector<1x1x128xf32>,
    return
  }
  func.func @transform_0(%arg0: i32, %arg1: i32, %arg2: memref<3xf32, #tpu.memory_space<smem>>) -> (i32, i32, i32, i32, i32) {
    %c0_i32 = arith.constant 0 : i32
    %c0_i32_0 = arith.constant 0 : i32
    %c0_i32_1 = arith.constant 0 : i32
    %c0_i32_2 = arith.constant 0 : i32
    return %arg1, %c0_i32, %c0_i32_0, %arg0, %c0_i32_1 : i32, i32, i32, i32, i32
  }
  func.func @transform_1(%arg0: i32, %arg1: i32, %arg2: memref<3xf32, #tpu.memory_space<smem>>) -> (i32, i32, i32, i32) {
    %c0_i32 = arith.constant 0 : i32
    %c0_i32_0 = arith.constant 0 : i32
    %c0_i32_1 = arith.constant 0 : i32
    %c0_i32_2 = arith.constant 0 : i32
    return %c0_i32, %c0_i32_0, %arg0, %c0_i32_1 : i32, i32, i32, i32
  }
  func.func @transform_2(%arg0: i32, %arg1: i32, %arg2: memref<3xf32, #tpu.memory_space<smem>>) -> (i32, i32, i32) {
    %c0_i32 = arith.constant 0 : i32
    %c0_i32_0 = arith.constant 0 : i32
    %c0_i32_1 = arith.constant 0 : i32
    return %c0_i32, %arg0, %c0_i32_0 : i32, i32, i32
  }
  func.func @transform_3(%arg0: i32, %arg1: i32, %arg2: memref<3xf32, #tpu.memory_space<smem>>) -> (i32, i32, i32) {
    %c0_i32 = arith.constant 0 : i32
    %c0_i32_0 = arith.constant 0 : i32
    %c0_i32_1 = arith.constant 0 : i32
    return %arg0, %c0_i32, %c0_i32_0 : i32, i32, i32
  }
}

</mosaic_0001>

<bundles_post_ra>
// kernel: tpu_custom_call.1
= control target key start
LH: loop header
LB: loop body
LE: loop exit
PB: predicated region body
PF: predicated region fallthrough
CT: control target
= control target key end

     0   :  { %s987_s0 = inlined_call_operand.hbm [shape: f32[3], index: 0, kind: input, shape index: {}]   ;;  %s988_s1 = inlined_call_operand.hbm [shape: f32[3,2,2,8,128], index: 1, kind: input, shape index: {}]   ;;  %s989_s2 = inlined_call_operand.hbm [shape: f32[2,2,8,128], index: 2, kind: input, shape index: {}]   ;;  %s990_s3 = inlined_call_operand.hbm [shape: f32[2,8,128], index: 3, kind: input, shape index: {}]   ;;  %s991_s4 = inlined_call_operand.hbm [shape: f32[1,1,128], index: 4, kind: output, shape index: {}]  }
   0x1   :  { %s523_s17 = scalar_lea.hbm %s987_s0, 16 }
   0x2   :  { %p524_p0 = scmp.ne.s32.totalorder %s987_s0, %s523_s17  ;;  %p527_p1 = scmp.lt.u32.totalorder %s523_s17, %s987_s0 }
   0x4   :  { %p529_p2 = pnand %p527_p1, %p524_p0 }
   0x6   :  { %532 = shalt.err (!%p529_p2)  }
   0x7   :  { %s707_s22 = smov [#allocation4]  }
   0x8   :  { %10 = dma.hbm_to_smem %s987_s0, 16, %s707_s22, [#allocation3] }
   0x9   :  { %669 = dma.done.wait [#allocation3], 16 }
   0xa   :  { %670 = vsyncadd [#allocation3], 4294967280 }
   0xb   :  { %12 = sfence }
   0xc   :  { %13 = vsyncpa [#allocation6], 0 }
   0xd   :  { %15 = vsyncpa [#allocation6 + $0x1], 0 }
   0xe   :  { %16 = vsyncpa [#allocation9], 0 }
   0xf   :  { %17 = vsyncpa [#allocation7], 0  ;;  %s752_s25 = smov 0   ;;  %s754_s26 = smov 0  }
  0x10   :  { %s756_s27 = smov 0   ;;  %s758_s28 = smov 0  }
  0x11   :  { %s760_s29 = smov 0   ;;  %s762_s30 = smov 0  }
  0x12 LB: > { %s412_s0 = sadd.s32 4294967295, %s705_s30   ;;  %p57_p3 = scmp.ne.s32.totalorder %s689_s26, %s685_s25  ;;  %s705_s30 = sphi %s762_s30, %s23_s30   ;;  %s701_s29 = sphi %s760_s29, %s1009_s29   ;;  %s697_s28 = sphi %s758_s28, %s1008_s28   ;;  %s693_s27 = sphi %s756_s27, %s1007_s27   ;;  %s689_s26 = sphi %s754_s26, %s1006_s26   ;;  %s685_s25 = sphi %s752_s25, %s1005_s25  }
  0x13   : > { %p784_p4 = scmp.eq.s32.totalorder %s412_s0, 0  ;;  %p413_p5 = scmp.ge.s32.totalorder %s705_s30, 1 }
  0x14   : > { %p146_p6 = scmp.lt.s32.totalorder %s705_s30, 4  ;;  %s708_s8 = smov [#allocation8]  }
  0x15   : > { %s996_s5 = scalar_select %p784_p4, 1, 0 }
  0x16   : > { %p792_p7 = por %p784_p4, %p57_p3  ;;  %p796_p8 = pnand %p413_p5, %p146_p6 }
  0x17   : > { %s160_s9 = sshll.u32 %s708_s8, 4  ;;  %s709_s11 = smov [#allocation10]   ;;  %s161_s9 = int_to_ptr.vmem [resolvable:$true] %s160_s9 }
  0x18   : > { %s997_s6 = scalar_select %p792_p7, 1, 0 }
  0x19   : > { %s998_s7 = scalar_select %p796_p8, 1, 0 }
  0x1a   : > { %p446_p9 = pneg %p796_p8  ;;  %s175_s12 = sshll.u32 %s709_s11, 4  ;;  %s808_s12 = int_to_ptr.vmem [resolvable:$true] %s175_s12 }
  0x1b   : > { %s533_s15 = scalar_lea.hbm %s989_s2, 512 }
  0x1c   : > { %p804_p10 = pnand %p446_p9, %p784_p4  ;;  %p534_p11 = scmp.ne.s32.totalorder %s989_s2, %s533_s15 }
  0x1d   : > { %p540_p1 = scmp.lt.u32.totalorder %s533_s15, %s989_s2 }
  0x1e   : > { %p535_p12 = pneg %p804_p10 }
  0x20   : > { %p536_p13 = pnand %p535_p12, %p534_p11 }
  0x22   : > { %p537_p0 = pneg %p536_p13 }
  0x24   : > { %p542_p2 = pnand %p540_p1, %p537_p0 }
  0x26   : > { %545 = shalt.err (!%p542_p2)
}
  0x27   : > { %s546_s20 = scalar_lea.vmem %s161_s9, 512  ;;  %p554_p9 = scmp.lt.s32.totalorder %s161_s9, %s161_s9 }
  0x28   : > { %p547_p3 = scmp.ne.s32.totalorder %s161_s9, %s546_s20  ;;  %p555_p4 = scmp.lt.s32.totalorder %s546_s20, %s546_s20 }
  0x2a   : > { %p549_p5 = pnand %p547_p3, %p535_p12  ;;  %p556_p7 = por %p555_p4, %p554_p9 }
  0x2c   : > { %p550_p6 = pneg %p549_p5 }
  0x2e   : > { %p557_p8 = pnand %p556_p7, %p550_p6 }
  0x30   : > { %560 = shalt.err (!%p557_p8)
}
  0x31   : > { %s710_s21 = smov 128   ;;  %s711_s22 = smov 8  }
  0x32   : > { %449 = dma.hbm_to_vmem [thread:$0]  (!%p804_p10), %s989_s2, 512, %s161_s9, [#allocation9], %s710_s21, %s710_s21, %s711_s22  }
  0x33   : > { %s561_s11 = scalar_lea.hbm %s990_s3, 256 }
  0x34   : > { %p562_p4 = scmp.ne.s32.totalorder %s990_s3, %s561_s11  ;;  %p568_p11 = scmp.lt.u32.totalorder %s561_s11, %s990_s3 }
  0x36   : > { %p564_p7 = pnand %p562_p4, %p535_p12 }
  0x38   : > { %p565_p8 = pneg %p564_p7 }
  0x3a   : > { %p570_p13 = pnand %p568_p11, %p565_p8 }
  0x3c   : > { %573 = shalt.err (!%p570_p13)
}
  0x3d   : > { %s574_s9 = scalar_lea.vmem %s808_s12, 256  ;;  %p582_p3 = scmp.lt.s32.totalorder %s808_s12, %s808_s12 }
  0x3e   : > { %p575_p0 = scmp.ne.s32.totalorder %s808_s12, %s574_s9  ;;  %p583_p5 = scmp.lt.s32.totalorder %s574_s9, %s574_s9 }
  0x40   : > { %p577_p1 = pnand %p575_p0, %p535_p12  ;;  %p584_p6 = por %p583_p5, %p582_p3 }
  0x42   : > { %p578_p2 = pneg %p577_p1 }
  0x44   : > { %p585_p9 = pnand %p584_p6, %p578_p2 }
  0x46   : > { %588 = shalt.err (!%p585_p9)
}
  0x47   : > { %452 = dma.hbm_to_vmem [thread:$0]  (!%p804_p10), %s990_s3, 256, %s808_s12, [#allocation9], %s710_s21, %s710_s21, %s711_s22  }
  0x48   : > { %s32_s19 = sadd.s32 1, %s701_s29  ;;  %s44_s10 = sadd.s32 1, %s693_s27 }
  0x49   : > { %p33_p12 = scmp.ge.s32.totalorder %s32_s19, 3  ;;  %p51_p4 = scmp.ne.s32.totalorder %s693_s27, %s689_s26 }
  0x4a   : > { %p52_p7 = scmp.eq.s32.totalorder %s705_s30, 0  ;;  %p459_p8 = scmp.lt.s32.totalorder %s705_s30, 3 }
  0x4b   : > { %s1011_s19 = smov (%p33_p12, %s32_s19), 0  ;;  %s189_s20 = sand.u32 1, %s693_s27  }
  0x4c   : > { %p53_p11 = por %p52_p7, %p51_p4  ;;  %s39_s23 = ssub.s32 %s701_s29, %s1011_s19 }
  0x4d   : > { %p42_p13 = scmp.eq.s32.totalorder %s39_s23, 0  ;;  %s417_s24 = sshll.u32 %s189_s20, 5 }
  0x4e   : > { %s431_s25 = sshll.u32 %s701_s29, 9  ;;  %s193_s14 = scalar_lea.vmem [#allocation5], %s417_s24 }
  0x4f   : > { %s876_s8 = scalar_select %p42_p13, %s693_s27, %s44_s10  }
  0x50   : > { %s881_s13 = scalar_lea.hbm %s988_s1, %s431_s25  ;;  %s201_s15 = sshll.u32 %s193_s14, 4  ;;  %s883_s15 = int_to_ptr.vmem [resolvable:$true] %s201_s15 }
  0x51   : > { %p887_p10 = pnand %p459_p8, %p53_p11  ;;  %s891_s9 = scalar_lea.sflag [#allocation6], %s189_s20 }
  0x52   : > { %s589_s17 = scalar_lea.hbm %s881_s13, 512  ;;  %s594_s23 = scalar_lea.hbm %s988_s1, 1536 }
  0x53   : > { %p590_p0 = scmp.ne.s32.totalorder %s881_s13, %s589_s17  ;;  %p591_p1 = pneg %p887_p10 }
  0x54   : > { %p595_p5 = scmp.lt.u32.totalorder %s881_s13, %s988_s1  ;;  %p596_p6 = scmp.lt.u32.totalorder %s594_s23, %s589_s17 }
  0x55   : > { %p592_p2 = pnand %p591_p1, %p590_p0  ;;  %p598_p12 = scmp.lt.u32.totalorder %s589_s17, %s881_s13 }
  0x56   : > { %p597_p9 = por %p596_p6, %p595_p5 }
  0x57   : > { %p593_p3 = pneg %p592_p2 }
  0x58   : > { %p599_p4 = por %p598_p12, %p597_p9 }
  0x5a   : > { %p600_p7 = pnand %p599_p4, %p593_p3 }
  0x5c   : > { %603 = shalt.err (!%p600_p7)
}
  0x5d   : > { %s604_s20 = scalar_lea.vmem %s883_s15, 512  ;;  %s712_s11 = smov [#allocation5]  }
  0x5e   : > { %p605_p8 = scmp.ne.s32.totalorder %s883_s15, %s604_s20  ;;  %s609_s12 = sshll.u32 %s712_s11, 4  ;;  %s610_s12 = int_to_ptr.vmem [resolvable:$false] %s609_s12 }
  0x5f   : > { %s611_s14 = scalar_lea.vmem %s610_s12, 1024  ;;  %p612_p0 = scmp.lt.s32.totalorder %s883_s15, %s610_s12 }
  0x60   : > { %p607_p11 = pnand %p605_p8, %p591_p1  ;;  %p613_p2 = scmp.lt.s32.totalorder %s611_s14, %s604_s20 }
  0x62   : > { %p608_p13 = pneg %p607_p11  ;;  %p614_p5 = por %p613_p2, %p612_p0 }
  0x64   : > { %p615_p6 = pnand %p614_p5, %p608_p13 }
  0x66   : > { %618 = shalt.err (!%p615_p6)
}
  0x67   : > { %456 = dma.hbm_to_vmem [thread:$0]  (!%p887_p10), %s881_s13, 512, %s883_s15, %s891_s9, %s710_s21, %s710_s21, %s711_s22  }
  0x68   : > { %p1001_p1 = scmp.ne.s32.totalorder %s998_s7, 0 }
  0x69   : > { %s215_s17 = sand.u32 (!%p1001_p1), 1, %s689_s26   ;;  %p1002_p3 = scmp.ne.s32.totalorder (!%p1001_p1), %s997_s6, 0 }
  0x6a   : > { %213 = sbr.rel (%p1001_p1) target bundleno = 188 (0xbc), region = 32  ;;  %s421_s18 = sshll.u32 (!%p1001_p1), %s215_s17, 5 }
  0x6b   : > { %s216_s10 = scalar_lea.sflag (!%p1001_p1), [#allocation6], %s215_s17  ;;  %s925_s23 = scalar_lea.vmem (!%p1001_p1), [#allocation5], %s421_s18 }
  0x71   : > { %672 = dma.done.wait (%p1002_p3), %s216_s10, 512  }
  0x72   : > { %674 = vsyncadd (%p1002_p3), %s216_s10, 4294966784  ;;  %p1003_p9 = scmp.ne.s32.totalorder %s996_s5, 0 }
  0x74   : > { %676 = dma.done.wait (%p1003_p9), [#allocation9], 768  }
  0x75   : > { %678 = vsyncadd (%p1003_p9), [#allocation9], 4294966528  ;;  %v245_v0 = vld [vmem:[#allocation8] sm:$0xff]  ;;  %v246_v1 = vld [vmem:[#allocation8 + $0x8] sm:$0xff]  ;;  %p424_p10 = scmp.ne.s32.totalorder %s697_s28, 0 }
  0x76   : > { %v247_v2 = vld [vmem:[#allocation8 + $0x10] sm:$0xff]  ;;  %v248_v3 = vld [vmem:[#allocation8 + $0x18] sm:$0xff]  ;;  %v253_v4 = vmul.f32 (!%p424_p10), %v245_v0, %v245_v0  ;;  %v254_v5 = vmul.f32 (!%p424_p10), %v246_v1, %v246_v1  ;;  %v713_v10 = vmov (!%p424_p10), 0.0   ;;  %v273_v13 = vld [vmem:[#allocation10] sm:$0xff] (!%p424_p10) }
  0x77   : > { %252 = sbr.rel (%p424_p10) target bundleno = 144 (0x90), region = 48  ;;  %v255_v6 = vmul.f32 (!%p424_p10), %v247_v2, %v247_v2  ;;  %v256_v7 = vmul.f32 (!%p424_p10), %v248_v3, %v248_v3  ;;  %287 = vst [vmem:[#allocation11] sm:$0x1] (!%p424_p10), %v713_v10  ;;  %v274_v17 = vld [vmem:[#allocation10 + $0x8] sm:$0xff] (!%p424_p10)  ;;  %vm275_vm4 = vcmp.ge.f32.partialorder (!%p424_p10), %v273_v13, 0.5 }
  0x78   : > { %v257_v8 = vadd.f32 (!%p424_p10), %v254_v5, %v253_v4  ;;  %vm276_vm5 = vcmp.ge.f32.partialorder (!%p424_p10), %v274_v17, 0.5 }
  0x79   : > { %v258_v9 = vadd.f32 (!%p424_p10), %v256_v7, %v255_v6 }
  0x7a   : > { %519 = vrsqrt.f32 (!%p424_p10), %v257_v8  ;;  %vm261_vm0 = vcmp.eq.f32.partialorder (!%p424_p10), %v257_v8, inf  ;;  %v264_v12 = vand.u32 (!%p424_p10), 2147483648, %v257_v8  ;;  %vm263_vm1 = vcmp.eq.f32.partialorder (!%p424_p10), %v257_v8, 0.0 }
  0x7b   : > { %521 = vrsqrt.f32 (!%p424_p10), %v258_v9  ;;  %vm268_vm2 = vcmp.eq.f32.partialorder (!%p424_p10), %v258_v9, inf  ;;  %v271_v16 = vand.u32 (!%p424_p10), 2147483648, %v258_v9  ;;  %vm270_vm3 = vcmp.eq.f32.partialorder (!%p424_p10), %v258_v9, 0.0 }
  0x84   : > { %v520_v11 = vpop.eup %519 }
  0x85   : > { %v522_v14 = vpop.eup %521  ;;  %v260_v15 = vmul.f32 %v520_v11, %v257_v8 }
  0x86   : > { %v267_v18 = vmul.f32 %v522_v14, %v258_v9 }
  0x87   : > { %v262_v19 = vsel %vm261_vm0, %v257_v8, %v260_v15 }
  0x88   : > { %v265_v20 = vsel %vm263_vm1, %v264_v12, %v262_v19  ;;  %v269_v21 = vsel %vm268_vm2, %v258_v9, %v267_v18 }
  0x89   : > { %v272_v22 = vsel %vm270_vm3, %v271_v16, %v269_v21  ;;  %vm277_vm6 = vcmp.lt.f32.partialorder %v265_v20, 5.0 }
  0x8a   : > { %vm278_vm7 = vcmp.lt.f32.partialorder %v272_v22, 5.0  ;;  %vm279_vm8 = vmand %vm275_vm4, %vm277_vm6 }
  0x8b   : > { %vm280_vm9 = vmand %vm276_vm5, %vm278_vm7  ;;  %v425_v23 = vsel %vm279_vm8, 1.0, %v713_v10 }
  0x8c   : > { %v426_v24 = vsel %vm280_vm9, 1.0, %v713_v10 }
  0x8d   : > { %v285_v25 = vadd.f32 %v426_v24, %v425_v23 }
  0x8f   : > { %286 = vst [vmem:[#allocation2] sm:$0xff] %v285_v25 }
  0x90 PF: > { %v288_v26 = vld [vmem:[%s925_s23] sm:$0xff]  ;;  %v289_v27 = vld [vmem:[%s925_s23 + $0x8] sm:$0xff]  ;;  %v290_v28 = vld [vmem:[%s925_s23 + $0x10] sm:$0xff]  ;;  %s312_s5 = sld [smem:[#allocation4 + %s697_s28]]  ;;  %s714_s6 = smov [#allocation11]  }
  0x91   : > { %v291_v29 = vld [vmem:[%s925_s23 + $0x18] sm:$0xff]  ;;  %v292_v30 = vsub.f32 %v288_v26, %v245_v0  ;;  %v293_v31 = vsub.f32 %v289_v27, %v246_v1  ;;  %v294_v32 = vsub.f32 %v290_v28, %v247_v2  ;;  %v311_v50 = vld [vmem:[#allocation11] sm:$0x1]  ;;  %s326_s7 = sshll.u32 %s714_s6, 4  ;;  %p943_p12 = scmp.eq.s32.totalorder %s412_s0, 2  ;;  %s327_s7 = int_to_ptr.vmem [resolvable:$true] %s326_s7 }
  0x92   : > { %v295_v33 = vsub.f32 %v291_v29, %v248_v3  ;;  %s619_s28 = scalar_lea.vmem %s327_s7, 16  ;;  %s625_s22 = scalar_lea.vmem %s327_s7, 32 }
  0x93   : > { %v296_v34 = vand.u32 2147483647, %v292_v30  ;;  %v297_v35 = vand.u32 2147483647, %v293_v31  ;;  %v298_v36 = vand.u32 2147483647, %v294_v32  ;;  %p620_p4 = scmp.ne.s32.totalorder %s327_s7, %s619_s28  ;;  %p626_p11 = scmp.lt.s32.totalorder %s327_s7, %s327_s7 }
  0x94   : > { %v299_v37 = vand.u32 2147483647, %v295_v33  ;;  %p627_p13 = scmp.lt.s32.totalorder %s625_s22, %s619_s28 }
  0x95   : > { %v300_v38 = vadd.f32 %v297_v35, %v296_v34  ;;  %p621_p7 = pnand %p620_p4, %p943_p12 }
  0x96   : > { %v303_v40 = vld [vmem:[#allocation2] sm:$0xff]  ;;  %v313_v48 = vstv %s312_s5  ;;  %p628_p0 = por %p627_p13, %p626_p11 }
  0x97   : > { %v301_v39 = vadd.f32 %v300_v38, %v298_v36  ;;  %p622_p8 = pneg %p621_p7 }
  0x99   : > { %v302_v41 = vadd.f32 %v301_v39, %v299_v37  ;;  %p629_p2 = pnand %p628_p0, %p622_p8 }
  0x9b   : > { %v304_v42 = vmul.f32 %v303_v40, %v302_v41 }
  0x9d   : > { %v305_v43 = vrot.slane %v304_v42, 4 }
  0x9f   : > { %v306_v44 = vadd.f32 %v305_v43, %v304_v42 }
  0xa1   : > { %v307_v45 = vrot.slane %v306_v44, 2 }
  0xa3   : > { %v308_v46 = vadd.f32 %v307_v45, %v306_v44 }
  0xa5   : > { %v309_v47 = vrot.slane %v308_v46, 1 }
  0xa7   : > { %v310_v49 = vadd.f32 %v309_v47, %v308_v46 }
  0xa9   : > { %v314_v51 = vmul.f32 %v313_v48, %v310_v49 }
  0xab   : > { %v315_v52 = vadd.f32 %v314_v51, %v311_v50 }
  0xad   : > { %316 = vst [vmem:[#allocation11] sm:$0x1] %v315_v52 }
  0xae   : > { %632 = shalt.err (!%p629_p2)
}
  0xaf   : > { %s633_s15 = scalar_lea.hbm %s991_s4, 16 }
  0xb0   : > { %p634_p5 = scmp.ne.s32.totalorder %s991_s4, %s633_s15  ;;  %p639_p3 = scmp.lt.u32.totalorder %s633_s15, %s991_s4 }
  0xb2   : > { %p635_p6 = pnand %p634_p5, %p943_p12 }
  0xb4   : > { %p636_p1 = pneg %p635_p6 }
  0xb6   : > { %p641_p9 = pnand %p639_p3, %p636_p1 }
  0xb8   : > { %644 = shalt.err (!%p641_p9)
}
  0xb9   : > { %443 = dma.vmem_to_hbm [thread:$0]  (%p943_p12), %s327_s7, 16, %s991_s4, [#allocation7]  }
  0xba   : > { %680 = dma.done.wait (%p943_p12), [#allocation7], 16  }
  0xbb   : > { %682 = vsyncadd (%p943_p12), [#allocation7], 4294967280 }
  0xbc PF: > { %s23_s30 = sadd.s32 1, %s705_s30   ;;  %s1005_s25 = smov %s689_s26 }
  0xbd   : > { %p20_p10 = scmp.ge.s32.totalorder %s23_s30, 5   ;;  %s1006_s26 = smov %s693_s27 }
  0xbe   : > { %s1007_s27 = smov %s876_s8  ;;  %s1008_s28 = smov %s701_s29 }
  0xbf   : > { %s1009_s29 = smov %s1011_s19  ;;  %22 = sbr.rel (!%p20_p10) target bundleno = 18 (0x12), region = 84 }
  0xc6   :  { %339 = vsyncpa [#allocation6], 1 }
  0xc7   :  { %341 = vsyncpa [#allocation6 + $0x1], 1 }
  0xc8   :  { %342 = vsyncpa [#allocation9], 1 }
  0xc9   :  { %343 = vsyncpa [#allocation7], 1 }
  0xca   :  { %345 = vsyncpa [#allocation7 + $0x1], 1 }

</bundles_post_ra>
